<compile_context>
chip_gen: v7x
topology: tpu7x:2x2x1
jax: 0.10.0
libtpu: 0.0.40
codegen_flags: <defaults>
</compile_context>

<pallas_src>
import functools

import jax
import jax.numpy as jnp
from jax import lax
from jax.experimental import pallas as pl
from jax.experimental.pallas import tpu as pltpu


def _round_up(x, m):
    return (x + m - 1) // m * m


# ---------------------------------------------------------------------------
# Kernel
# ---------------------------------------------------------------------------
def _deter2var_kernel(x_ref, w_ref, b_ref, out_ref, acc_ref, *,
                      n_half, act_type):
    """Fused two-head linear + activation epilogue.

    Grid = (batch tiles, K tiles).  Columns [0, n_half) of the fused output
    are the mean head, [n_half, 2*n_half) the var head.
    """
    k = pl.program_id(1)

    @pl.when(k == 0)
    def _():
        acc_ref[...] = jnp.zeros_like(acc_ref)

    # bf16 x bf16 -> f32 accumulate on the MXU.
    acc_ref[...] += jnp.dot(x_ref[...], w_ref[...],
                            preferred_element_type=jnp.float32)

    @pl.when(k == pl.num_programs(1) - 1)
    def _():
        y = acc_ref[...] + b_ref[...]                    # f32, (tb, 2*n_half)
        if act_type == "softplus":
            # numerically stable softplus (EUP exp/log; VPU max/abs)
            act = jnp.maximum(y, 0.0) + jnp.log(1.0 + jnp.exp(-jnp.abs(y)))
        elif act_type == "sigmoid":
            act = 1.0 / (1.0 + jnp.exp(-y))
        else:
            raise ValueError(f"unknown act_type {act_type}")
        var = 0.1 + 0.9 * act
        # Column mask: first half -> raw linear (mean), second half -> var.
        col = lax.broadcasted_iota(jnp.int32, y.shape, 1)
        out_ref[...] = jnp.where(col < n_half, y, var).astype(out_ref.dtype)


# ---------------------------------------------------------------------------
# Sizing helpers
# ---------------------------------------------------------------------------
def _vmem_capacity_bytes():
    try:
        cap = int(getattr(pltpu.get_tpu_info(), "vmem_capacity_bytes", 0))
        if cap > 0:
            return cap
    except Exception:
        pass
    return 64 * 1024 * 1024          # conservative fallback (v7x per-TC)


def _choose_tiling(B, n_in, n_tot, budget, tk_override=None):
    """Pick (tb, tk, single_k) so the pipelined working set fits `budget`.

    Footprint (bytes): 2 bufs of bf16 x block, wbufs of bf16 W tile + f32
    bias, 2 bufs of the f32 fused output block, plus the f32 accumulator.
    """
    def footprint(tb, tk, wbufs):
        return (2 * tb * tk * 2                 # x blocks (bf16)
                + wbufs * tk * n_tot * 2        # W tile(s) (bf16)
                + wbufs * n_tot * 4             # bias
                + 2 * tb * n_tot * 4            # output blocks (f32)
                + tb * n_tot * 4)               # accumulator scratch (f32)

    b_full = _round_up(max(B, 1), 16)

    if tk_override is not None:
        tk = int(tk_override)
        single_k = tk >= n_in
        if single_k:
            tk = n_in
    elif footprint(16, n_in, 1) <= budget:
        tk, single_k = n_in, True               # whole fused weight resident
    else:
        tk, single_k = 512, False               # K-tiled fallback (P3)
        while tk > 128 and footprint(16, tk, 2) > budget:
            tk //= 2

    wbufs = 1 if single_k else 2
    tb = 16
    for cand in (2048, 1024, 512, 256, 128, 64, 32, 16):
        t = _round_up(min(cand, b_full), 16)
        if footprint(t, tk, wbufs) <= budget:
            tb = t
            break

    # Keep the "parallel" batch axis with >=2 (ideally 4) grid steps so
    # v7x's second TensorCore is fed, when B is large enough to split.
    if b_full >= 64:
        tb = min(tb, _round_up(pl.cdiv(b_full, 4), 16))
    elif b_full >= 32:
        tb = min(tb, _round_up(pl.cdiv(b_full, 2), 16))
    return tb, tk, single_k


# ---------------------------------------------------------------------------
# Wrapper-side parameter packing (call ONCE per parameter update)
# ---------------------------------------------------------------------------
def pack_deter2var_params(w_mean, b_mean, w_var, b_var):
    """Fuse the two heads into one [n_in, 2*n_half] bf16 weight + f32 bias.

    Weights are expected as [n_in, n_out] (transposed vs. PyTorch nn.Linear
    storage).  Heads are lane-padded to a multiple of 128 only when
    n_out >= 128; small heads keep their true width (avoids 8x HBM write
    amplification at e.g. n_out=16).
    """
    n_in, n_out = w_mean.shape
    n_half = n_out if n_out < 128 else _round_up(n_out, 128)
    pad = n_half - n_out
    f32 = jnp.float32

    wm = jnp.pad(w_mean.astype(f32), ((0, 0), (0, pad)))
    wv = jnp.pad(w_var.astype(f32), ((0, 0), (0, pad)))
    w_fused = jnp.concatenate([wm, wv], axis=1).astype(jnp.bfloat16)

    bm = jnp.pad(b_mean.reshape(1, -1).astype(f32), ((0, 0), (0, pad)))
    bv = jnp.pad(b_var.reshape(1, -1).astype(f32), ((0, 0), (0, pad)))
    b_fused = jnp.concatenate([bm, bv], axis=1)          # stays f32
    return w_fused, b_fused, n_out, n_half


# ---------------------------------------------------------------------------
# Forward
# ---------------------------------------------------------------------------
def deter2var_packed(x, w_fused, b_fused, n_out, n_half, *,
                     act_type="softplus", tk=None):
    """Returns (mean, var) of the Normal produced by Deter2Var."""
    B, n_in = x.shape
    n_tot = 2 * n_half
    assert w_fused.shape == (n_in, n_tot)

    cap = _vmem_capacity_bytes()
    vmem_limit = min(int(cap * 0.75), 100 * 1024 * 1024)
    budget = int(vmem_limit * 0.8)

    tb, tk, single_k = _choose_tiling(B, n_in, n_tot, budget, tk_override=tk)

    # Pad batch to a tb multiple and K to a tk multiple (zeros are exact for
    # the matmul); x goes to bf16 for the MXU and halved DMA bytes.
    B_pad = _round_up(B, tb)
    K_pad = _round_up(n_in, tk)
    x_p = x.astype(jnp.bfloat16)
    if B_pad != B or K_pad != n_in:
        x_p = jnp.pad(x_p, ((0, B_pad - B), (0, K_pad - n_in)))
    w_p = w_fused
    if K_pad != n_in:
        w_p = jnp.pad(w_p, ((0, K_pad - n_in), (0, 0)))

    grid = (B_pad // tb, K_pad // tk)
    kernel = functools.partial(_deter2var_kernel, n_half=n_half,
                               act_type=act_type)

    def call(use_single_buffer):
        # Constant-index weight/bias: one VMEM buffer is enough when the
        # whole fused weight is resident (single K step).
        w_mode = (pl.Buffered(1) if (use_single_buffer and single_k) else None)
        in_specs = [
            pl.BlockSpec((tb, tk), lambda i, k: (i, k)),            # x (pipelined)
            pl.BlockSpec((tk, n_tot), lambda i, k: (k, 0),
                         pipeline_mode=w_mode),                      # fused W
            pl.BlockSpec((1, n_tot), lambda i, k: (0, 0),
                         pipeline_mode=w_mode),                      # fused b
        ]
        return pl.pallas_call(
            kernel,
            out_shape=jax.ShapeDtypeStruct((B_pad, n_tot), jnp.float32),
            grid=grid,
            in_specs=in_specs,
            out_specs=pl.BlockSpec((tb, n_tot), lambda i, k: (i, 0)),
            scratch_shapes=[pltpu.VMEM((tb, n_tot), jnp.float32)],
            compiler_params=pltpu.CompilerParams(
                dimension_semantics=("parallel", "arbitrary"),
                vmem_limit_bytes=vmem_limit),
        )(x_p, w_p, b_fused)

    try:
        out = call(True)
    except Exception:
        # pipeline_mode=pl.Buffered(1) unsupported on this jax/libtpu combo.
        out = call(False)

    mean = out[:B, :n_out]
    var = out[:B, n_half:n_half + n_out]
    return mean, var


def deter2var(x, w_mean, b_mean, w_var, b_var, *, act_type="softplus",
              tk=None):
    """Convenience one-shot wrapper (packs params every call — prefer
    pack_deter2var_params + deter2var_packed inside MAML inner loops)."""
    packed = pack_deter2var_params(w_mean, b_mean, w_var, b_var)
    return deter2var_packed(x, *packed, act_type=act_type, tk=tk)


# ---------------------------------------------------------------------------
# Reference + self-test
# ---------------------------------------------------------------------------
def _reference(x, w_mean, b_mean, w_var, b_var, act_type):
    mean = x @ w_mean + b_mean
    prevar = x @ w_var + b_var
    if act_type == "softplus":
        act = jax.nn.softplus(prevar)
    else:
        act = jax.nn.sigmoid(prevar)
    return mean, 0.1 + 0.9 * act


if __name__ == "__main__":
    ok = True
    cases = [
        # (B, n_in, n_out, act_type, tk)  — small shapes consistent w/ module
        (8, 32, 16, "softplus", None),      # unpadded narrow heads, weight resident
        (8, 32, 16, "sigmoid", None),
        (48, 256, 128, "softplus", 128),    # lane-aligned heads + K-tiled path
    ]
    for idx, (B, n_in, n_out, act_type, tk) in enumerate(cases):
        key = jax.random.fold_in(jax.random.PRNGKey(0), idx)
        k_x, k_wm, k_bm, k_wv, k_bv = jax.random.split(key, 5)
        bound = 1.0 / float(n_in) ** 0.5
        x = jax.random.normal(k_x, (B, n_in), dtype=jnp.float32)
        w_mean = jax.random.uniform(k_wm, (n_in, n_out), jnp.float32, -bound, bound)
        b_mean = jax.random.uniform(k_bm, (1, n_out), jnp.float32, -bound, bound)
        w_var = jax.random.uniform(k_wv, (n_in, n_out), jnp.float32, -bound, bound)
        b_var = jax.random.uniform(k_bv, (1, n_out), jnp.float32, -bound, bound)

        # Pack once (outside the per-step path), then run the kernel.
        packed = pack_deter2var_params(w_mean, b_mean, w_var, b_var)
        mean, var = deter2var_packed(x, *packed, act_type=act_type, tk=tk)
        jax.block_until_ready((mean, var))

        # Strict check against a reference at matching (bf16-operand) precision.
        xb = x.astype(jnp.bfloat16).astype(jnp.float32)
        wmb = w_mean.astype(jnp.bfloat16).astype(jnp.float32)
        wvb = w_var.astype(jnp.bfloat16).astype(jnp.float32)
        r_mean, r_var = _reference(xb, wmb, b_mean, wvb, b_var, act_type)
        ok &= bool(jnp.allclose(mean, r_mean, atol=2e-3, rtol=2e-3))
        ok &= bool(jnp.allclose(var, r_var, atol=2e-3, rtol=2e-3))

        # Loose check against the full-f32 PyTorch-equivalent reference.
        f_mean, f_var = _reference(x, w_mean, b_mean, w_var, b_var, act_type)
        ok &= bool(jnp.allclose(mean, f_mean, atol=5e-2, rtol=5e-2))
        ok &= bool(jnp.allclose(var, f_var, atol=5e-2, rtol=5e-2))
        ok &= bool(jnp.all(var > 0.0))      # valid Normal scale

    assert ok
    print("KERNEL_OK")
</pallas_src>

<mosaic_0001>
module attributes {stable_mosaic.version = 11 : i64} {
  func.func @_deter2var_kernel(%arg0: i32, %arg1: i32, %arg2: memref<16x32xbf16, #tpu.memory_space<vmem>>, %arg3: memref<32x32xbf16, #tpu.memory_space<vmem>>, %arg4: memref<1x32xf32, #tpu.memory_space<vmem>>, %arg5: memref<16x32xf32, #tpu.memory_space<vmem>>, %arg6: memref<16x32xf32, #tpu.memory_space<vmem>>) attributes {dimension_semantics = [#tpu.dimension_semantics<parallel>, #tpu.dimension_semantics<arbitrary>], iteration_bounds = array<i64: 1, 1>, scalar_prefetch = 0 : i64, scratch_operands = 1 : i64, tpu.core_type = #tpu.core_type<tc>, window_params = [{transform_indices = @transform_0, window_bounds = array<i64: 16, 32>}, {pipeline_mode = #tpu.pipeline_mode<synchronous>, transform_indices = @transform_1, window_bounds = array<i64: 32, 32>}, {pipeline_mode = #tpu.pipeline_mode<synchronous>, transform_indices = @transform_2, window_bounds = array<i64: 1, 32>}, {transform_indices = @transform_3, window_bounds = array<i64: 16, 32>}]} {
    %c0_i32 = arith.constant 0 : i32
    %0 = arith.cmpi eq, %arg1, %c0_i32 : i32
    %1 = arith.extui %0 : i1 to i32
    %c0_i32_0 = arith.constant 0 : i32
    %2 = arith.cmpi ne, %1, %c0_i32_0 : i32
    scf.if %2 {
      %cst_10 = arith.constant 0.000000e+00 : f32
      %12 = vector.broadcast %cst_10 : f32 to vector<16x32xf32>
      %c0_11 = arith.constant 0 : index
      %c0_12 = arith.constant 0 : index
      %13 = vector.load %arg6[%c0_11, %c0_12] : memref<16x32xf32, #tpu.memory_space<vmem>>, vector<16x32xf32>
      tpu.vector_store %arg6[%c0_11, %c0_12], %12 {strides = array<i32>} : memref<16x32xf32, #tpu.memory_space<vmem>>, vector<16x32xf32>,
    } else {
    }
    %c0 = arith.constant 0 : index
    %c0_1 = arith.constant 0 : index
    %3 = vector.load %arg6[%c0, %c0_1] : memref<16x32xf32, #tpu.memory_space<vmem>>, vector<16x32xf32>
    %c0_2 = arith.constant 0 : index
    %c0_3 = arith.constant 0 : index
    %4 = vector.load %arg2[%c0_2, %c0_3] : memref<16x32xbf16, #tpu.memory_space<vmem>>, vector<16x32xbf16>
    %c0_4 = arith.constant 0 : index
    %c0_5 = arith.constant 0 : index
    %5 = vector.load %arg3[%c0_4, %c0_5] : memref<32x32xbf16, #tpu.memory_space<vmem>>, vector<32x32xbf16>
    %cst = arith.constant dense<0.000000e+00> : vector<16x32xf32>
    %6 = tpu.matmul %4, %5, %cst {dimension_numbers = #tpu.dot_dimension_numbers<[1], [0], [0], [1], [0, 0, 1, 1], [], []>} : vector<16x32xbf16>, vector<32x32xbf16>, vector<16x32xf32> -> vector<16x32xf32>
    %7 = arith.addf %3, %6 : vector<16x32xf32>
    %c0_6 = arith.constant 0 : index
    %c0_7 = arith.constant 0 : index
    %8 = vector.load %arg6[%c0_6, %c0_7] : memref<16x32xf32, #tpu.memory_space<vmem>>, vector<16x32xf32>
    tpu.vector_store %arg6[%c0_6, %c0_7], %7 {strides = array<i32>} : memref<16x32xf32, #tpu.memory_space<vmem>>, vector<16x32xf32>,
    %c0_i32_8 = arith.constant 0 : i32
    %9 = arith.cmpi eq, %arg1, %c0_i32_8 : i32
    %10 = arith.extui %9 : i1 to i32
    %c0_i32_9 = arith.constant 0 : i32
    %11 = arith.cmpi ne, %10, %c0_i32_9 : i32
    scf.if %11 {
      %c0_10 = arith.constant 0 : index
      %c0_11 = arith.constant 0 : index
      %12 = vector.load %arg6[%c0_10, %c0_11] : memref<16x32xf32, #tpu.memory_space<vmem>>, vector<16x32xf32>
      %c0_12 = arith.constant 0 : index
      %c0_13 = arith.constant 0 : index
      %13 = vector.load %arg4[%c0_12, %c0_13] : memref<1x32xf32, #tpu.memory_space<vmem>>, vector<1x32xf32>
      %14 = vector.broadcast %13 : vector<1x32xf32> to vector<16x32xf32>
      %15 = arith.addf %12, %14 : vector<16x32xf32>
      %cst_14 = arith.constant 0.000000e+00 : f32
      %16 = vector.broadcast %cst_14 : f32 to vector<16x32xf32>
      %17 = arith.maximumf %15, %16 : vector<16x32xf32>
      %18 = math.absf %15 : vector<16x32xf32>
      %cst_15 = arith.constant 0.000000e+00 : f32
      %19 = vector.broadcast %cst_15 : f32 to vector<16x32xf32>
      %20 = arith.subf %19, %18 : vector<16x32xf32>
      %21 = math.exp %20 : vector<16x32xf32>
      %cst_16 = arith.constant 1.000000e+00 : f32
      %22 = vector.broadcast %cst_16 : f32 to vector<16x32xf32>
      %23 = arith.addf %22, %21 : vector<16x32xf32>
      %24 = math.log %23 : vector<16x32xf32>
      %25 = arith.addf %17, %24 : vector<16x32xf32>
      %cst_17 = arith.constant 0.899999976 : f32
      %26 = vector.broadcast %cst_17 : f32 to vector<16x32xf32>
      %27 = arith.mulf %26, %25 : vector<16x32xf32>
      %cst_18 = arith.constant 1.000000e-01 : f32
      %28 = vector.broadcast %cst_18 : f32 to vector<16x32xf32>
      %29 = arith.addf %28, %27 : vector<16x32xf32>
      %30 = tpu.iota {dimensions = array<i32: 1>} : vector<16x32xi32>
      %c16_i32 = arith.constant 16 : i32
      %31 = vector.broadcast %c16_i32 : i32 to vector<16x32xi32>
      %32 = arith.cmpi slt, %30, %31 : vector<16x32xi32>
      %33 = arith.select %32, %15, %29 : vector<16x32xi1>, vector<16x32xf32>
      %c0_19 = arith.constant 0 : index
      %c0_20 = arith.constant 0 : index
      %34 = vector.load %arg5[%c0_19, %c0_20] : memref<16x32xf32, #tpu.memory_space<vmem>>, vector<16x32xf32>
      tpu.vector_store %arg5[%c0_19, %c0_20], %33 {strides = array<i32>} : memref<16x32xf32, #tpu.memory_space<vmem>>, vector<16x32xf32>,
    } else {
    }
    return
  }
  func.func @transform_0(%arg0: i32, %arg1: i32) -> (i32, i32) {
    %c0_i32 = arith.constant 0 : i32
    return %arg0, %arg1 : i32, i32
  }
  func.func @transform_1(%arg0: i32, %arg1: i32) -> (i32, i32) {
    %c0_i32 = arith.constant 0 : i32
    %c0_i32_0 = arith.constant 0 : i32
    return %arg1, %c0_i32 : i32, i32
  }
  func.func @transform_2(%arg0: i32, %arg1: i32) -> (i32, i32) {
    %c0_i32 = arith.constant 0 : i32
    %c0_i32_0 = arith.constant 0 : i32
    %c0_i32_1 = arith.constant 0 : i32
    return %c0_i32, %c0_i32_0 : i32, i32
  }
  func.func @transform_3(%arg0: i32, %arg1: i32) -> (i32, i32) {
    %c0_i32 = arith.constant 0 : i32
    %c0_i32_0 = arith.constant 0 : i32
    return %arg0, %c0_i32 : i32, i32
  }
}

module attributes {stable_mosaic.version = 11 : i64} {
  func.func @_deter2var_kernel(%arg0: i32, %arg1: i32, %arg2: memref<16x32xbf16, #tpu.memory_space<vmem>>, %arg3: memref<32x32xbf16, #tpu.memory_space<vmem>>, %arg4: memref<1x32xf32, #tpu.memory_space<vmem>>, %arg5: memref<16x32xf32, #tpu.memory_space<vmem>>, %arg6: memref<16x32xf32, #tpu.memory_space<vmem>>) attributes {dimension_semantics = [#tpu.dimension_semantics<parallel>, #tpu.dimension_semantics<arbitrary>], iteration_bounds = array<i64: 1, 1>, scalar_prefetch = 0 : i64, scratch_operands = 1 : i64, tpu.core_type = #tpu.core_type<tc>, window_params = [{transform_indices = @transform_0, window_bounds = array<i64: 16, 32>}, {transform_indices = @transform_1, window_bounds = array<i64: 32, 32>}, {pipeline_mode = #tpu.pipeline_mode<synchronous>, transform_indices = @transform_2, window_bounds = array<i64: 1, 32>}, {transform_indices = @transform_3, window_bounds = array<i64: 16, 32>}]} {
    %c0_i32 = arith.constant 0 : i32
    %0 = arith.cmpi eq, %arg1, %c0_i32 : i32
    %1 = arith.extui %0 : i1 to i32
    %c0_i32_0 = arith.constant 0 : i32
    %2 = arith.cmpi ne, %1, %c0_i32_0 : i32
    scf.if %2 {
      %cst_10 = arith.constant 0.000000e+00 : f32
      %12 = vector.broadcast %cst_10 : f32 to vector<16x32xf32>
      %c0_11 = arith.constant 0 : index
      %c0_12 = arith.constant 0 : index
      %13 = vector.load %arg6[%c0_11, %c0_12] : memref<16x32xf32, #tpu.memory_space<vmem>>, vector<16x32xf32>
      tpu.vector_store %arg6[%c0_11, %c0_12], %12 {strides = array<i32>} : memref<16x32xf32, #tpu.memory_space<vmem>>, vector<16x32xf32>,
    } else {
    }
    %c0 = arith.constant 0 : index
    %c0_1 = arith.constant 0 : index
    %3 = vector.load %arg6[%c0, %c0_1] : memref<16x32xf32, #tpu.memory_space<vmem>>, vector<16x32xf32>
    %c0_2 = arith.constant 0 : index
    %c0_3 = arith.constant 0 : index
    %4 = vector.load %arg2[%c0_2, %c0_3] : memref<16x32xbf16, #tpu.memory_space<vmem>>, vector<16x32xbf16>
    %c0_4 = arith.constant 0 : index
    %c0_5 = arith.constant 0 : index
    %5 = vector.load %arg3[%c0_4, %c0_5] : memref<32x32xbf16, #tpu.memory_space<vmem>>, vector<32x32xbf16>
    %cst = arith.constant dense<0.000000e+00> : vector<16x32xf32>
    %6 = tpu.matmul %4, %5, %cst {dimension_numbers = #tpu.dot_dimension_numbers<[1], [0], [0], [1], [0, 0, 1, 1], [], []>} : vector<16x32xbf16>, vector<32x32xbf16>, vector<16x32xf32> -> vector<16x32xf32>
    %7 = arith.addf %3, %6 : vector<16x32xf32>
    %c0_6 = arith.constant 0 : index
    %c0_7 = arith.constant 0 : index
    %8 = vector.load %arg6[%c0_6, %c0_7] : memref<16x32xf32, #tpu.memory_space<vmem>>, vector<16x32xf32>
    tpu.vector_store %arg6[%c0_6, %c0_7], %7 {strides = array<i32>} : memref<16x32xf32, #tpu.memory_space<vmem>>, vector<16x32xf32>,
    %c0_i32_8 = arith.constant 0 : i32
    %9 = arith.cmpi eq, %arg1, %c0_i32_8 : i32
    %10 = arith.extui %9 : i1 to i32
    %c0_i32_9 = arith.constant 0 : i32
    %11 = arith.cmpi ne, %10, %c0_i32_9 : i32
    scf.if %11 {
      %c0_10 = arith.constant 0 : index
      %c0_11 = arith.constant 0 : index
      %12 = vector.load %arg6[%c0_10, %c0_11] : memref<16x32xf32, #tpu.memory_space<vmem>>, vector<16x32xf32>
      %c0_12 = arith.constant 0 : index
      %c0_13 = arith.constant 0 : index
      %13 = vector.load %arg4[%c0_12, %c0_13] : memref<1x32xf32, #tpu.memory_space<vmem>>, vector<1x32xf32>
      %14 = vector.broadcast %13 : vector<1x32xf32> to vector<16x32xf32>
      %15 = arith.addf %12, %14 : vector<16x32xf32>
      %cst_14 = arith.constant 0.000000e+00 : f32
      %16 = vector.broadcast %cst_14 : f32 to vector<16x32xf32>
      %17 = arith.maximumf %15, %16 : vector<16x32xf32>
      %18 = math.absf %15 : vector<16x32xf32>
      %cst_15 = arith.constant 0.000000e+00 : f32
      %19 = vector.broadcast %cst_15 : f32 to vector<16x32xf32>
      %20 = arith.subf %19, %18 : vector<16x32xf32>
      %21 = math.exp %20 : vector<16x32xf32>
      %cst_16 = arith.constant 1.000000e+00 : f32
      %22 = vector.broadcast %cst_16 : f32 to vector<16x32xf32>
      %23 = arith.addf %22, %21 : vector<16x32xf32>
      %24 = math.log %23 : vector<16x32xf32>
      %25 = arith.addf %17, %24 : vector<16x32xf32>
      %cst_17 = arith.constant 0.899999976 : f32
      %26 = vector.broadcast %cst_17 : f32 to vector<16x32xf32>
      %27 = arith.mulf %26, %25 : vector<16x32xf32>
      %cst_18 = arith.constant 1.000000e-01 : f32
      %28 = vector.broadcast %cst_18 : f32 to vector<16x32xf32>
      %29 = arith.addf %28, %27 : vector<16x32xf32>
      %30 = tpu.iota {dimensions = array<i32: 1>} : vector<16x32xi32>
      %c16_i32 = arith.constant 16 : i32
      %31 = vector.broadcast %c16_i32 : i32 to vector<16x32xi32>
      %32 = arith.cmpi slt, %30, %31 : vector<16x32xi32>
      %33 = arith.select %32, %15, %29 : vector<16x32xi1>, vector<16x32xf32>
      %c0_19 = arith.constant 0 : index
      %c0_20 = arith.constant 0 : index
      %34 = vector.load %arg5[%c0_19, %c0_20] : memref<16x32xf32, #tpu.memory_space<vmem>>, vector<16x32xf32>
      tpu.vector_store %arg5[%c0_19, %c0_20], %33 {strides = array<i32>} : memref<16x32xf32, #tpu.memory_space<vmem>>, vector<16x32xf32>,
    } else {
    }
    return
  }
  func.func @transform_0(%arg0: i32, %arg1: i32) -> (i32, i32) {
    %c0_i32 = arith.constant 0 : i32
    return %arg0, %arg1 : i32, i32
  }
  func.func @transform_1(%arg0: i32, %arg1: i32) -> (i32, i32) {
    %c0_i32 = arith.constant 0 : i32
    %c0_i32_0 = arith.constant 0 : i32
    return %arg1, %c0_i32 : i32, i32
  }
  func.func @transform_2(%arg0: i32, %arg1: i32) -> (i32, i32) {
    %c0_i32 = arith.constant 0 : i32
    %c0_i32_0 = arith.constant 0 : i32
    %c0_i32_1 = arith.constant 0 : i32
    return %c0_i32, %c0_i32_0 : i32, i32
  }
  func.func @transform_3(%arg0: i32, %arg1: i32) -> (i32, i32) {
    %c0_i32 = arith.constant 0 : i32
    %c0_i32_0 = arith.constant 0 : i32
    return %arg0, %c0_i32 : i32, i32
  }
}

</mosaic_0001>

<bundles_post_ra>
// kernel: tpu_custom_call.1
= control target key start
LH: loop header
LB: loop body
LE: loop exit
PB: predicated region body
PF: predicated region fallthrough
CT: control target
= control target key end

     0   :  { %8 = vsyncpa [#allocation4], 0  ;;  %s369_s0 = inlined_call_operand.hbm [shape: bf16[16,32], index: 0, kind: input, shape index: {}]   ;;  %s370_s1 = inlined_call_operand.hbm [shape: bf16[32,32], index: 1, kind: input, shape index: {}]   ;;  %s371_s2 = inlined_call_operand.vmem [shape: f32[1,32], index: 2, kind: input, shape index: {}]   ;;  %s372_s3 = inlined_call_operand.hbm [shape: f32[16,32], index: 3, kind: output, shape index: {}]  }
   0x1   :  { %9 = vsyncpa [#allocation7], 0 }
   0x2   :  { %10 = vsyncpa [#allocation5], 0  ;;  %s294_s12 = smov [#allocation3]   ;;  %s222_s16 = scalar_lea.hbm %s369_s0, 128 }
   0x3   :  { %s16_s13 = sshll.u32 %s294_s12, 4  ;;  %p223_p0 = scmp.ne.s32.totalorder %s369_s0, %s222_s16  ;;  %s17_s13 = int_to_ptr.vmem [resolvable:$true] %s16_s13 }
   0x4   :  { %p226_p1 = scmp.lt.u32.totalorder %s222_s16, %s369_s0 }
   0x6   :  { %p228_p2 = pnand %p226_p1, %p223_p0 }
   0x8   :  { %231 = shalt.err (!%p228_p2)
}
   0x9   :  { %s232_s21 = scalar_lea.vmem %s17_s13, 128  ;;  %p237_p4 = scmp.lt.s32.totalorder %s17_s13, %s17_s13 }
   0xa   :  { %p233_p3 = scmp.ne.s32.totalorder %s17_s13, %s232_s21  ;;  %p238_p5 = scmp.lt.s32.totalorder %s232_s21, %s232_s21 }
   0xc   :  { %p239_p6 = por %p238_p5, %p237_p4 }
   0xe   :  { %p240_p7 = pnand %p239_p6, %p233_p3 }
  0x10   :  { %243 = shalt.err (!%p240_p7)
}
  0x11   :  { %s295_s22 = smov 64   ;;  %s296_s23 = smov 4  }
  0x12   :  { %22 = dma.hbm_to_vmem [thread:$0]  %s369_s0, 128, %s17_s13, [#allocation4], %s295_s22, %s295_s22, %s296_s23  }
  0x13   :  { %s297_s26 = smov [#allocation6]   ;;  %s244_s30 = scalar_lea.hbm %s370_s1, 256 }
  0x14   :  { %s28_s27 = sshll.u32 %s297_s26, 4  ;;  %p245_p8 = scmp.ne.s32.totalorder %s370_s1, %s244_s30  ;;  %s29_s27 = int_to_ptr.vmem [resolvable:$true] %s28_s27 }
  0x15   :  { %p248_p9 = scmp.lt.u32.totalorder %s244_s30, %s370_s1 }
  0x17   :  { %p250_p10 = pnand %p248_p9, %p245_p8 }
  0x19   :  { %253 = shalt.err (!%p250_p10)
}
  0x1a   :  { %s254_s8 = scalar_lea.vmem %s29_s27, 256  ;;  %p259_p12 = scmp.lt.s32.totalorder %s29_s27, %s29_s27 }
  0x1b   :  { %p255_p11 = scmp.ne.s32.totalorder %s29_s27, %s254_s8  ;;  %p260_p13 = scmp.lt.s32.totalorder %s254_s8, %s254_s8 }
  0x1d   :  { %p261_p0 = por %p260_p13, %p259_p12 }
  0x1f   :  { %p262_p1 = pnand %p261_p0, %p255_p11 }
  0x21   :  { %265 = shalt.err (!%p262_p1)
}
  0x22   :  { %34 = dma.hbm_to_vmem [thread:$0]  %s370_s1, 256, %s29_s27, [#allocation7], %s295_s22, %s295_s22, %s296_s23  }
  0x23   :  { %288 = dma.done.wait [#allocation4], 128  }
  0x24   :  { %289 = vsyncadd [#allocation4], 4294967168 }
  0x25   :  { %290 = dma.done.wait [#allocation7], 256  }
  0x26   :  { %291 = vsyncadd [#allocation7], 4294967040  ;;  %vm48_vm0 = vcmask 261120   ;;  %v298_v0 = vmov 0.0   ;;  %vm299_vm1 = vmmov 0   ;;  %v211_v1 = vld [vmem:[#allocation6] sm:$0xff]   ;;  %v161_v27 = vlaneseq }
  0x27   :  { %194 = vmatprep.subr.bf16.mxu0 %v298_v0  ;;  %198 = vmatprep.mubr.msk.bf16.mxu0 %vm299_vm1, %v298_v0  ;;  %49 = vst.msk [vmem:[#allocation2] sm:$0xff] %vm48_vm0, %v298_v0  ;;  %50 = vst.msk [vmem:[#allocation2 + $0x8] sm:$0xff] %vm48_vm0, %v298_v0  ;;  %v212_v2 = vld [vmem:[#allocation6 + $0x8] sm:$0xff]   ;;  %v213_v3 = vld [vmem:[#allocation3] sm:$0xff]  }
  0x28   :  { %195 = vmatpush3.bf16.msra.mxu0 %v211_v1  ;;  %v190_v12 = vld [vmem:[%s371_s2] ss:$0 sm:$0xff]  ;;  %v162_v32 = vand.u32 127, %v161_v27  ;;  %s300_s2 = smov [#allocation8]  }
  0x29   :  { %196 = vmatprep.subr.bf16.mxu0 %v298_v0  ;;  %s173_s11 = sshll.u32 %s300_s2, 4  ;;  %s174_s11 = int_to_ptr.vmem [resolvable:$true] %s173_s11 }
  0x2a   :  { %vm163_vm2 = vcmp.lt.s32.totalorder %v162_v32, 16  ;;  %s266_s12 = scalar_lea.vmem %s174_s11, 256  ;;  %p271_p3 = scmp.lt.s32.totalorder %s174_s11, %s174_s11 }
  0x2b   :  { %p267_p2 = scmp.ne.s32.totalorder %s174_s11, %s266_s12  ;;  %p272_p4 = scmp.lt.s32.totalorder %s266_s12, %s266_s12 }
  0x2c   :  { %197 = vmatpush3.bf16.msra.mxu0 %v212_v2 }
  0x2d   :  { %p273_p5 = por %p272_p4, %p271_p3 }
  0x2e   :  { %v51_v4 = vld [vmem:[#allocation2] sm:$0xff]  ;;  %v52_v6 = vld [vmem:[#allocation2 + $0x8] sm:$0xff] }
  0x2f   :  { %199 = vmatmul.mubr.msk.bf16.vlgmr.msra.gmra.mrb[0].mxu0 %vm48_vm0, %v213_v3  ;;  %p274_p6 = pnand %p273_p5, %p267_p2 }
 0x102   :  { %v114_v5 = vpop.f32.mrb[0].mxu0 }
 0x103   :  { %v121_v7 = vadd.f32 %v114_v5, %v51_v4  ;;  %v200_v8 = vpop.f32.mrb[1].mxu0 }
 0x104   :  { %v117_v9 = vpop.f32.mrb[2].mxu0 }
 0x105   :  { %123 = vst.msk [vmem:[#allocation2] sm:$0xff] %vm48_vm0, %v121_v7  ;;  %v122_v10 = vadd.f32 %v117_v9, %v52_v6  ;;  %v201_v11 = vpop.f32.mrb[3].mxu0 }
 0x107   :  { %124 = vst.msk [vmem:[#allocation2 + $0x8] sm:$0xff] %vm48_vm0, %v122_v10 }
 0x10c   :  { %v128_v13 = vld [vmem:[#allocation2] sm:$0xff] }
 0x10d   :  { %v137_v14 = vadd.f32 %v190_v12, %v128_v13 }
 0x10e   :  { %v129_v15 = vld [vmem:[#allocation2 + $0x8] sm:$0xff] }
 0x10f   :  { %v138_v16 = vadd.f32 %v190_v12, %v129_v15  ;;  %v141_v17 = vand.u32 2147483647, %v137_v14  ;;  %v139_v29 = vmax.f32 %v137_v14, 0.0 }
 0x111   :  { %v142_v18 = vand.u32 2147483647, %v138_v16  ;;  %v143_v19 = vsub.f32 0.0, %v141_v17  ;;  %v140_v33 = vmax.f32 %v138_v16, 0.0 }
 0x113   :  { %v144_v20 = vsub.f32 0.0, %v142_v18  ;;  %v145_v21 = vmul.f32 1.442695, %v143_v19 }
 0x115   :  { %214 = vpow2.f32 %v145_v21  ;;  %v147_v22 = vmul.f32 1.442695, %v144_v20 }
 0x117   :  { %216 = vpow2.f32 %v147_v22 }
 0x11f   :  { %v215_v23 = vpop.eup %214 }
 0x120   :  { %v149_v24 = vadd.f32 1.0, %v215_v23 }
 0x121   :  { %v217_v25 = vpop.eup %216 }
 0x122   :  { %v150_v26 = vadd.f32 1.0, %v217_v25  ;;  %218 = vlog2.f32 %v149_v24 }
 0x124   :  { %220 = vlog2.f32 %v150_v26 }
 0x12c   :  { %v219_v28 = vpop.eup %218 }
 0x12d   :  { %v152_v30 = vmul.f32 0.6931472, %v219_v28 }
 0x12e   :  { %v221_v31 = vpop.eup %220 }
 0x12f   :  { %v154_v34 = vmul.f32 0.6931472, %v221_v31  ;;  %v155_v35 = vadd.f32 %v152_v30, %v139_v29 }
 0x131   :  { %v156_v36 = vadd.f32 %v154_v34, %v140_v33  ;;  %v157_v37 = vmul.f32 0.9, %v155_v35 }
 0x133   :  { %v158_v38 = vmul.f32 0.9, %v156_v36  ;;  %v159_v39 = vadd.f32 0.1, %v157_v37 }
 0x135   :  { %v160_v40 = vadd.f32 0.1, %v158_v38  ;;  %v164_v41 = vsel %vm163_vm2, %v137_v14, %v159_v39 }
 0x136   :  { %166 = vst.msk [vmem:[#allocation8] sm:$0xff] %vm48_vm0, %v164_v41 }
 0x137   :  { %v165_v42 = vsel %vm163_vm2, %v138_v16, %v160_v40 }
 0x138   :  { %167 = vst.msk [vmem:[#allocation8 + $0x8] sm:$0xff] %vm48_vm0, %v165_v42 }
 0x139   :  { %277 = shalt.err (!%p274_p6)
}
 0x13a   :  { %s278_s15 = scalar_lea.hbm %s372_s3, 256 }
 0x13b   :  { %p279_p7 = scmp.ne.s32.totalorder %s372_s3, %s278_s15  ;;  %p282_p8 = scmp.lt.u32.totalorder %s278_s15, %s372_s3 }
 0x13d   :  { %p284_p9 = pnand %p282_p8, %p279_p7 }
 0x13f   :  { %287 = shalt.err (!%p284_p9)
}
 0x140   :  { %s301_s20 = smov 128   ;;  %s302_s21 = smov 8  }
 0x141   :  { %179 = dma.vmem_to_hbm [thread:$0]  %s174_s11, 256, %s372_s3, [#allocation5], %s301_s20, %s301_s20, %s302_s21  }
 0x142   :  { %292 = dma.done.wait [#allocation5], 256  }
 0x143   :  { %293 = vsyncadd [#allocation5], 4294967040 }
 0x144   :  { %183 = vsyncpa [#allocation4], 1 }
 0x145   :  { %184 = vsyncpa [#allocation7], 1 }
 0x146   :  { %185 = vsyncpa [#allocation5], 1 }

// kernel: tpu_custom_call.1
= control target key start
LH: loop header
LB: loop body
LE: loop exit
PB: predicated region body
PF: predicated region fallthrough
CT: control target
= control target key end

     0   :  { %8 = vsyncpa [#allocation4], 0  ;;  %s369_s0 = inlined_call_operand.hbm [shape: bf16[16,32], index: 0, kind: input, shape index: {}]   ;;  %s370_s1 = inlined_call_operand.hbm [shape: bf16[32,32], index: 1, kind: input, shape index: {}]   ;;  %s371_s2 = inlined_call_operand.vmem [shape: f32[1,32], index: 2, kind: input, shape index: {}]   ;;  %s372_s3 = inlined_call_operand.hbm [shape: f32[16,32], index: 3, kind: output, shape index: {}]  }
   0x1   :  { %9 = vsyncpa [#allocation7], 0 }
   0x2   :  { %10 = vsyncpa [#allocation5], 0  ;;  %s294_s12 = smov [#allocation3]   ;;  %s222_s16 = scalar_lea.hbm %s369_s0, 128 }
   0x3   :  { %s16_s13 = sshll.u32 %s294_s12, 4  ;;  %p223_p0 = scmp.ne.s32.totalorder %s369_s0, %s222_s16  ;;  %s17_s13 = int_to_ptr.vmem [resolvable:$true] %s16_s13 }
   0x4   :  { %p226_p1 = scmp.lt.u32.totalorder %s222_s16, %s369_s0 }
   0x6   :  { %p228_p2 = pnand %p226_p1, %p223_p0 }
   0x8   :  { %231 = shalt.err (!%p228_p2)
}
   0x9   :  { %s232_s21 = scalar_lea.vmem %s17_s13, 128  ;;  %p237_p4 = scmp.lt.s32.totalorder %s17_s13, %s17_s13 }
   0xa   :  { %p233_p3 = scmp.ne.s32.totalorder %s17_s13, %s232_s21  ;;  %p238_p5 = scmp.lt.s32.totalorder %s232_s21, %s232_s21 }
   0xc   :  { %p239_p6 = por %p238_p5, %p237_p4 }
   0xe   :  { %p240_p7 = pnand %p239_p6, %p233_p3 }
  0x10   :  { %243 = shalt.err (!%p240_p7)
}
  0x11   :  { %s295_s22 = smov 64   ;;  %s296_s23 = smov 4  }
  0x12   :  { %22 = dma.hbm_to_vmem [thread:$0]  %s369_s0, 128, %s17_s13, [#allocation4], %s295_s22, %s295_s22, %s296_s23  }
  0x13   :  { %s297_s26 = smov [#allocation6]   ;;  %s244_s30 = scalar_lea.hbm %s370_s1, 256 }
  0x14   :  { %s28_s27 = sshll.u32 %s297_s26, 4  ;;  %p245_p8 = scmp.ne.s32.totalorder %s370_s1, %s244_s30  ;;  %s29_s27 = int_to_ptr.vmem [resolvable:$true] %s28_s27 }
  0x15   :  { %p248_p9 = scmp.lt.u32.totalorder %s244_s30, %s370_s1 }
  0x17   :  { %p250_p10 = pnand %p248_p9, %p245_p8 }
  0x19   :  { %253 = shalt.err (!%p250_p10)
}
  0x1a   :  { %s254_s8 = scalar_lea.vmem %s29_s27, 256  ;;  %p259_p12 = scmp.lt.s32.totalorder %s29_s27, %s29_s27 }
  0x1b   :  { %p255_p11 = scmp.ne.s32.totalorder %s29_s27, %s254_s8  ;;  %p260_p13 = scmp.lt.s32.totalorder %s254_s8, %s254_s8 }
  0x1d   :  { %p261_p0 = por %p260_p13, %p259_p12 }
  0x1f   :  { %p262_p1 = pnand %p261_p0, %p255_p11 }
  0x21   :  { %265 = shalt.err (!%p262_p1)
}
  0x22   :  { %34 = dma.hbm_to_vmem [thread:$0]  %s370_s1, 256, %s29_s27, [#allocation7], %s295_s22, %s295_s22, %s296_s23  }
  0x23   :  { %288 = dma.done.wait [#allocation4], 128  }
  0x24   :  { %289 = vsyncadd [#allocation4], 4294967168 }
  0x25   :  { %290 = dma.done.wait [#allocation7], 256  }
  0x26   :  { %291 = vsyncadd [#allocation7], 4294967040  ;;  %vm48_vm0 = vcmask 261120   ;;  %v298_v0 = vmov 0.0   ;;  %vm299_vm1 = vmmov 0   ;;  %v211_v1 = vld [vmem:[#allocation6] sm:$0xff]   ;;  %v161_v27 = vlaneseq }
  0x27   :  { %194 = vmatprep.subr.bf16.mxu0 %v298_v0  ;;  %198 = vmatprep.mubr.msk.bf16.mxu0 %vm299_vm1, %v298_v0  ;;  %49 = vst.msk [vmem:[#allocation2] sm:$0xff] %vm48_vm0, %v298_v0  ;;  %50 = vst.msk [vmem:[#allocation2 + $0x8] sm:$0xff] %vm48_vm0, %v298_v0  ;;  %v212_v2 = vld [vmem:[#allocation6 + $0x8] sm:$0xff]   ;;  %v213_v3 = vld [vmem:[#allocation3] sm:$0xff]  }
  0x28   :  { %195 = vmatpush3.bf16.msra.mxu0 %v211_v1  ;;  %v190_v12 = vld [vmem:[%s371_s2] ss:$0 sm:$0xff]  ;;  %v162_v32 = vand.u32 127, %v161_v27  ;;  %s300_s2 = smov [#allocation8]  }
  0x29   :  { %196 = vmatprep.subr.bf16.mxu0 %v298_v0  ;;  %s173_s11 = sshll.u32 %s300_s2, 4  ;;  %s174_s11 = int_to_ptr.vmem [resolvable:$true] %s173_s11 }
  0x2a   :  { %vm163_vm2 = vcmp.lt.s32.totalorder %v162_v32, 16  ;;  %s266_s12 = scalar_lea.vmem %s174_s11, 256  ;;  %p271_p3 = scmp.lt.s32.totalorder %s174_s11, %s174_s11 }
  0x2b   :  { %p267_p2 = scmp.ne.s32.totalorder %s174_s11, %s266_s12  ;;  %p272_p4 = scmp.lt.s32.totalorder %s266_s12, %s266_s12 }
  0x2c   :  { %197 = vmatpush3.bf16.msra.mxu0 %v212_v2 }
  0x2d   :  { %p273_p5 = por %p272_p4, %p271_p3 }
  0x2e   :  { %v51_v4 = vld [vmem:[#allocation2] sm:$0xff]  ;;  %v52_v6 = vld [vmem:[#allocation2 + $0x8] sm:$0xff] }
  0x2f   :  { %199 = vmatmul.mubr.msk.bf16.vlgmr.msra.gmra.mrb[0].mxu0 %vm48_vm0, %v213_v3  ;;  %p274_p6 = pnand %p273_p5, %p267_p2 }
 0x102   :  { %v114_v5 = vpop.f32.mrb[0].mxu0 }
 0x103   :  { %v121_v7 = vadd.f32 %v114_v5, %v51_v4  ;;  %v200_v8 = vpop.f32.mrb[1].mxu0 }
 0x104   :  { %v117_v9 = vpop.f32.mrb[2].mxu0 }
 0x105   :  { %123 = vst.msk [vmem:[#allocation2] sm:$0xff] %vm48_vm0, %v121_v7  ;;  %v122_v10 = vadd.f32 %v117_v9, %v52_v6  ;;  %v201_v11 = vpop.f32.mrb[3].mxu0 }
 0x107   :  { %124 = vst.msk [vmem:[#allocation2 + $0x8] sm:$0xff] %vm48_vm0, %v122_v10 }
 0x10c   :  { %v128_v13 = vld [vmem:[#allocation2] sm:$0xff] }
 0x10d   :  { %v137_v14 = vadd.f32 %v190_v12, %v128_v13 }
 0x10e   :  { %v129_v15 = vld [vmem:[#allocation2 + $0x8] sm:$0xff] }
 0x10f   :  { %v138_v16 = vadd.f32 %v190_v12, %v129_v15  ;;  %v141_v17 = vand.u32 2147483647, %v137_v14  ;;  %v139_v29 = vmax.f32 %v137_v14, 0.0 }
 0x111   :  { %v142_v18 = vand.u32 2147483647, %v138_v16  ;;  %v143_v19 = vsub.f32 0.0, %v141_v17  ;;  %v140_v33 = vmax.f32 %v138_v16, 0.0 }
 0x113   :  { %v144_v20 = vsub.f32 0.0, %v142_v18  ;;  %v145_v21 = vmul.f32 1.442695, %v143_v19 }
 0x115   :  { %214 = vpow2.f32 %v145_v21  ;;  %v147_v22 = vmul.f32 1.442695, %v144_v20 }
 0x117   :  { %216 = vpow2.f32 %v147_v22 }
 0x11f   :  { %v215_v23 = vpop.eup %214 }
 0x120   :  { %v149_v24 = vadd.f32 1.0, %v215_v23 }
 0x121   :  { %v217_v25 = vpop.eup %216 }
 0x122   :  { %v150_v26 = vadd.f32 1.0, %v217_v25  ;;  %218 = vlog2.f32 %v149_v24 }
 0x124   :  { %220 = vlog2.f32 %v150_v26 }
 0x12c   :  { %v219_v28 = vpop.eup %218 }
 0x12d   :  { %v152_v30 = vmul.f32 0.6931472, %v219_v28 }
 0x12e   :  { %v221_v31 = vpop.eup %220 }
 0x12f   :  { %v154_v34 = vmul.f32 0.6931472, %v221_v31  ;;  %v155_v35 = vadd.f32 %v152_v30, %v139_v29 }
 0x131   :  { %v156_v36 = vadd.f32 %v154_v34, %v140_v33  ;;  %v157_v37 = vmul.f32 0.9, %v155_v35 }
 0x133   :  { %v158_v38 = vmul.f32 0.9, %v156_v36  ;;  %v159_v39 = vadd.f32 0.1, %v157_v37 }
 0x135   :  { %v160_v40 = vadd.f32 0.1, %v158_v38  ;;  %v164_v41 = vsel %vm163_vm2, %v137_v14, %v159_v39 }
 0x136   :  { %166 = vst.msk [vmem:[#allocation8] sm:$0xff] %vm48_vm0, %v164_v41 }
 0x137   :  { %v165_v42 = vsel %vm163_vm2, %v138_v16, %v160_v40 }
 0x138   :  { %167 = vst.msk [vmem:[#allocation8 + $0x8] sm:$0xff] %vm48_vm0, %v165_v42 }
 0x139   :  { %277 = shalt.err (!%p274_p6)
}
 0x13a   :  { %s278_s15 = scalar_lea.hbm %s372_s3, 256 }
 0x13b   :  { %p279_p7 = scmp.ne.s32.totalorder %s372_s3, %s278_s15  ;;  %p282_p8 = scmp.lt.u32.totalorder %s278_s15, %s372_s3 }
 0x13d   :  { %p284_p9 = pnand %p282_p8, %p279_p7 }
 0x13f   :  { %287 = shalt.err (!%p284_p9)
}
 0x140   :  { %s301_s20 = smov 128   ;;  %s302_s21 = smov 8  }
 0x141   :  { %179 = dma.vmem_to_hbm [thread:$0]  %s174_s11, 256, %s372_s3, [#allocation5], %s301_s20, %s301_s20, %s302_s21  }
 0x142   :  { %292 = dma.done.wait [#allocation5], 256  }
 0x143   :  { %293 = vsyncadd [#allocation5], 4294967040 }
 0x144   :  { %183 = vsyncpa [#allocation4], 1 }
 0x145   :  { %184 = vsyncpa [#allocation7], 1 }
 0x146   :  { %185 = vsyncpa [#allocation5], 1 }

</bundles_post_ra>
